<compile_context>
chip_gen: v6e
topology: v6e:2x2x1
jax: 0.10.0
libtpu: 0.0.40
codegen_flags: <defaults>
</compile_context>

<pallas_src>
import jax
import jax.numpy as jnp
from jax.experimental import pallas as pl
from jax.experimental.pallas import tpu as pltpu

B, T, D, C = 8, 4, 32, 80   # small synthetic shapes; C=80 matches MSCOCO classes
LANE = 128                  # TPU lane width
N_STEPS = 4                 # number of inner-loop steps batched per pallas_call


# ---------------------------------------------------------------------------
# Fused per-step kernel: target-max + classifier forward + weighted BCE
#                        + meta-weight update candidate
# ---------------------------------------------------------------------------
def learner_step_kernel(tgt_ref, x_ref, w_ref, b_ref, clsw_ref,
                        logits_ref, loss_ref, neww_ref):
    t_frames = tgt_ref.shape[1]
    bsz = x_ref.shape[1]

    # target = target.max(dim=1)[0]
    # tgt tile is [1, T, B, Cp]: each frame slice is a dense (8,128)-aligned tile,
    # so the reduction is (T-1) elementwise VPU maximums (no XLU reduce).
    y = tgt_ref[0, 0]
    for t in range(1, t_frames):                     # T=4: optimal unroll
        y = jnp.maximum(y, tgt_ref[0, t])

    # classifier head forward: bf16 operands on the MXU, f32 accumulate.
    z = jnp.dot(x_ref[0], w_ref[...],
                preferred_element_type=jnp.float32) + b_ref[...]           # [B, Cp] f32

    # numerically stable BCE-with-logits (f32 on VPU/EUP, v5e-safe):
    #   max(z,0) - z*y + log1p(exp(-|z|))
    bce = jnp.maximum(z, 0.0) - z * y + jnp.log1p(jnp.exp(-jnp.abs(z)))    # [B, Cp]

    # batch-mean folded into a constant multiply; per-class weighted loss.
    inv_b = 1.0 / bsz
    per_class = (jnp.sum(bce, axis=0, keepdims=True) * inv_b) * clsw_ref[...]  # [1, Cp]

    logits_ref[0] = z                                                      # output_train
    loss_ref[0] = per_class                                                # criteria(...)
    # self.weights = torch.sigmoid(outputs.mean(dim=0))
    neww_ref[0] = jax.nn.sigmoid(jnp.sum(z, axis=0, keepdims=True) * inv_b)


# ---------------------------------------------------------------------------
# One-time layout preparation (hoisted out of the per-step hot path)
# ---------------------------------------------------------------------------
def prepare_head_params(w, b, class_weights):
    """Pad classifier head to lane-dense [*, Cp] layout. Call once; keep resident."""
    d, c = w.shape
    cp = pl.cdiv(c, LANE) * LANE
    pad_c = cp - c
    w_p = jnp.pad(w, ((0, 0), (0, pad_c))).astype(jnp.bfloat16)            # [D, Cp] bf16
    b_p = jnp.pad(b.astype(jnp.float32).reshape(1, c), ((0, 0), (0, pad_c)))
    cw_p = jnp.pad(class_weights.astype(jnp.float32).reshape(1, c),
                   ((0, 0), (0, pad_c)))                                   # padded lanes = 0
    return w_p, b_p, cw_p


def prepare_targets(target):
    """[N, B, T, C] -> [N, T, B, Cp] f32 (dense (8,128) tiles). Do upstream, once."""
    n, bsz, t, c = target.shape
    cp = pl.cdiv(c, LANE) * LANE
    return jnp.pad(jnp.transpose(target.astype(jnp.float32), (0, 2, 1, 3)),
                   ((0, 0), (0, 0), (0, 0), (0, cp - c)))


def prepare_features(x):
    """Backbone features -> bf16 MXU operands. Do once per data batch."""
    return x.astype(jnp.bfloat16)


# ---------------------------------------------------------------------------
# Hot path: N batched inner-loop steps in one pallas_call (no pads/casts/slices)
# ---------------------------------------------------------------------------
@jax.jit
def learner_steps(tgt_p, x_p, w_p, b_p, cw_p):
    n, t, bsz, cp = tgt_p.shape
    d = x_p.shape[-1]

    logits_p, loss_p, neww_p = pl.pallas_call(
        learner_step_kernel,
        out_shape=(
            jax.ShapeDtypeStruct((n, bsz, cp), jnp.float32),   # output_train (logits)
            jax.ShapeDtypeStruct((n, 1, cp), jnp.float32),     # per-class weighted BCE
            jax.ShapeDtypeStruct((n, 1, cp), jnp.float32),     # updated self.weights
        ),
        grid=(n,),
        in_specs=[
            pl.BlockSpec((1, t, bsz, cp), lambda s: (s, 0, 0, 0)),   # targets (per step)
            pl.BlockSpec((1, bsz, d), lambda s: (s, 0, 0)),          # features (per step)
            pl.BlockSpec((d, cp), lambda s: (0, 0)),                 # W: resident
            pl.BlockSpec((1, cp), lambda s: (0, 0)),                 # b: resident
            pl.BlockSpec((1, cp), lambda s: (0, 0)),                 # class weights: resident
        ],
        out_specs=(
            pl.BlockSpec((1, bsz, cp), lambda s: (s, 0, 0)),
            pl.BlockSpec((1, 1, cp), lambda s: (s, 0, 0)),
            pl.BlockSpec((1, 1, cp), lambda s: (s, 0, 0)),
        ),
        compiler_params=pltpu.CompilerParams(
            dimension_semantics=("parallel",)),                      # both TCs on v7x
    )(tgt_p, x_p, w_p, b_p, cw_p)

    # loss.max() / loss.sum() per step, one fused reduction for all N steps.
    # Padded per-class entries are exactly 0 (zero-padded, non-negative weights),
    # so reducing over the full padded lane dim is exact — no masks needed.
    loss_max = jnp.max(loss_p[:, 0, :], axis=-1)
    loss_sum = jnp.sum(loss_p[:, 0, :], axis=-1)
    return logits_p, loss_p, neww_p, loss_max, loss_sum


if __name__ == "__main__":
    key = jax.random.PRNGKey(0)
    k_x, k_w, k_b, k_t, k_cw = jax.random.split(key, 5)

    # deterministic synthetic inputs / parameters (N inner-loop steps)
    x = jax.random.normal(k_x, (N_STEPS, B, D), dtype=jnp.float32)
    W = jax.random.normal(k_w, (D, C), dtype=jnp.float32) * 0.1
    bias = jax.random.normal(k_b, (C,), dtype=jnp.float32) * 0.01
    target = (jax.random.uniform(k_t, (N_STEPS, B, T, C)) > 0.8).astype(jnp.float32)
    class_weights = jax.random.uniform(k_cw, (C,), dtype=jnp.float32)  # torch.rand(80)

    # one-time layout/cast prep (kept resident across all inner-loop steps)
    w_p, b_p, cw_p = prepare_head_params(W, bias, class_weights)
    tgt_p = prepare_targets(target)
    x_p = prepare_features(x)

    logits_p, loss_p, neww_p, loss_max, loss_sum = learner_steps(
        tgt_p, x_p, w_p, b_p, cw_p)
    jax.block_until_ready((logits_p, loss_p, neww_p, loss_max, loss_sum))

    # slice to the real 80 classes only when reporting
    logits = logits_p[:, :, :C]
    per_class_loss = loss_p[:, 0, :C]
    new_weights = neww_p[:, 0, :C]

    # pure-JAX reference (same bf16 MXU operands, f32 accumulate / vector math)
    y_ref = jnp.max(target, axis=2)                                        # [N, B, C]
    z_ref = jnp.einsum("nbd,dc->nbc", x.astype(jnp.bfloat16),
                       W.astype(jnp.bfloat16),
                       preferred_element_type=jnp.float32) + bias          # [N, B, C]
    bce_ref = (jnp.maximum(z_ref, 0.0) - z_ref * y_ref
               + jnp.log1p(jnp.exp(-jnp.abs(z_ref))))
    loss_ref = jnp.mean(bce_ref, axis=1) * class_weights                   # [N, C]
    neww_ref = jax.nn.sigmoid(jnp.mean(z_ref, axis=1))                     # [N, C]

    assert jnp.allclose(logits, z_ref, atol=5e-3, rtol=1e-3)
    assert jnp.allclose(per_class_loss, loss_ref, atol=5e-3, rtol=1e-3)
    assert jnp.allclose(new_weights, neww_ref, atol=5e-3, rtol=1e-3)
    assert jnp.allclose(loss_max, jnp.max(loss_ref, axis=-1), atol=5e-3, rtol=1e-3)
    assert jnp.allclose(loss_sum, jnp.sum(loss_ref, axis=-1), atol=5e-3, rtol=1e-3)

    print("KERNEL_OK")
</pallas_src>

<mosaic_0001>
module attributes {stable_mosaic.version = 11 : i64} {
  func.func @learner_step_kernel(%arg0: i32, %arg1: memref<1x4x8x128xf32, #tpu.memory_space<vmem>>, %arg2: memref<1x8x32xbf16, #tpu.memory_space<vmem>>, %arg3: memref<32x128xbf16, #tpu.memory_space<vmem>>, %arg4: memref<1x128xf32, #tpu.memory_space<vmem>>, %arg5: memref<1x128xf32, #tpu.memory_space<vmem>>, %arg6: memref<1x8x128xf32, #tpu.memory_space<vmem>>, %arg7: memref<1x1x128xf32, #tpu.memory_space<vmem>>, %arg8: memref<1x1x128xf32, #tpu.memory_space<vmem>>) attributes {dimension_semantics = [#tpu.dimension_semantics<parallel>], iteration_bounds = array<i64: 4>, scalar_prefetch = 0 : i64, scratch_operands = 0 : i64, tpu.core_type = #tpu.core_type<tc>, window_params = [{transform_indices = @transform_0, window_bounds = array<i64: 1, 4, 8, 128>}, {transform_indices = @transform_1, window_bounds = array<i64: 1, 8, 32>}, {pipeline_mode = #tpu.pipeline_mode<synchronous>, transform_indices = @transform_2, window_bounds = array<i64: 32, 128>}, {pipeline_mode = #tpu.pipeline_mode<synchronous>, transform_indices = @transform_3, window_bounds = array<i64: 1, 128>}, {pipeline_mode = #tpu.pipeline_mode<synchronous>, transform_indices = @transform_4, window_bounds = array<i64: 1, 128>}, {transform_indices = @transform_5, window_bounds = array<i64: 1, 8, 128>}, {transform_indices = @transform_6, window_bounds = array<i64: 1, 1, 128>}, {transform_indices = @transform_7, window_bounds = array<i64: 1, 1, 128>}]} {
    %c0 = arith.constant 0 : index
    %c0_0 = arith.constant 0 : index
    %c0_1 = arith.constant 0 : index
    %c0_2 = arith.constant 0 : index
    %0 = vector.load %arg1[%c0, %c0_0, %c0_1, %c0_2] : memref<1x4x8x128xf32, #tpu.memory_space<vmem>>, vector<1x1x8x128xf32>
    %1 = vector.shape_cast %0 : vector<1x1x8x128xf32> to vector<8x128xf32>
    %c0_3 = arith.constant 0 : index
    %c1 = arith.constant 1 : index
    %c0_4 = arith.constant 0 : index
    %c0_5 = arith.constant 0 : index
    %2 = vector.load %arg1[%c0_3, %c1, %c0_4, %c0_5] : memref<1x4x8x128xf32, #tpu.memory_space<vmem>>, vector<1x1x8x128xf32>
    %3 = vector.shape_cast %2 : vector<1x1x8x128xf32> to vector<8x128xf32>
    %4 = arith.maximumf %1, %3 : vector<8x128xf32>
    %c0_6 = arith.constant 0 : index
    %c2 = arith.constant 2 : index
    %c0_7 = arith.constant 0 : index
    %c0_8 = arith.constant 0 : index
    %5 = vector.load %arg1[%c0_6, %c2, %c0_7, %c0_8] : memref<1x4x8x128xf32, #tpu.memory_space<vmem>>, vector<1x1x8x128xf32>
    %6 = vector.shape_cast %5 : vector<1x1x8x128xf32> to vector<8x128xf32>
    %7 = arith.maximumf %4, %6 : vector<8x128xf32>
    %c0_9 = arith.constant 0 : index
    %c3 = arith.constant 3 : index
    %c0_10 = arith.constant 0 : index
    %c0_11 = arith.constant 0 : index
    %8 = vector.load %arg1[%c0_9, %c3, %c0_10, %c0_11] : memref<1x4x8x128xf32, #tpu.memory_space<vmem>>, vector<1x1x8x128xf32>
    %9 = vector.shape_cast %8 : vector<1x1x8x128xf32> to vector<8x128xf32>
    %10 = arith.maximumf %7, %9 : vector<8x128xf32>
    %c0_12 = arith.constant 0 : index
    %c0_13 = arith.constant 0 : index
    %c0_14 = arith.constant 0 : index
    %11 = vector.load %arg2[%c0_12, %c0_13, %c0_14] : memref<1x8x32xbf16, #tpu.memory_space<vmem>>, vector<1x8x32xbf16>
    %12 = vector.shape_cast %11 : vector<1x8x32xbf16> to vector<8x32xbf16>
    %c0_15 = arith.constant 0 : index
    %c0_16 = arith.constant 0 : index
    %13 = vector.load %arg3[%c0_15, %c0_16] : memref<32x128xbf16, #tpu.memory_space<vmem>>, vector<32x128xbf16>
    %cst = arith.constant dense<0.000000e+00> : vector<8x128xf32>
    %14 = tpu.matmul %12, %13, %cst {dimension_numbers = #tpu.dot_dimension_numbers<[1], [0], [0], [1], [0, 0, 1, 1], [], []>} : vector<8x32xbf16>, vector<32x128xbf16>, vector<8x128xf32> -> vector<8x128xf32>
    %c0_17 = arith.constant 0 : index
    %c0_18 = arith.constant 0 : index
    %15 = vector.load %arg4[%c0_17, %c0_18] : memref<1x128xf32, #tpu.memory_space<vmem>>, vector<1x128xf32>
    %16 = vector.broadcast %15 : vector<1x128xf32> to vector<8x128xf32>
    %17 = arith.addf %14, %16 : vector<8x128xf32>
    %cst_19 = arith.constant 0.000000e+00 : f32
    %18 = vector.broadcast %cst_19 : f32 to vector<8x128xf32>
    %19 = arith.maximumf %17, %18 : vector<8x128xf32>
    %20 = arith.mulf %17, %10 : vector<8x128xf32>
    %21 = arith.subf %19, %20 : vector<8x128xf32>
    %22 = math.absf %17 : vector<8x128xf32>
    %cst_20 = arith.constant 0.000000e+00 : f32
    %23 = vector.broadcast %cst_20 : f32 to vector<8x128xf32>
    %24 = arith.subf %23, %22 : vector<8x128xf32>
    %25 = math.exp %24 : vector<8x128xf32>
    %26 = math.log1p %25 : vector<8x128xf32>
    %27 = arith.addf %21, %26 : vector<8x128xf32>
    %cst_21 = arith.constant dense<0.000000e+00> : vector<128xf32>
    %28 = vector.multi_reduction <add>, %27, %cst_21 [0] : vector<8x128xf32> to vector<128xf32>
    %29 = vector.shape_cast %28 : vector<128xf32> to vector<1x128xf32>
    %cst_22 = arith.constant 1.250000e-01 : f32
    %30 = vector.broadcast %cst_22 : f32 to vector<1x128xf32>
    %31 = arith.mulf %29, %30 : vector<1x128xf32>
    %c0_23 = arith.constant 0 : index
    %c0_24 = arith.constant 0 : index
    %32 = vector.load %arg5[%c0_23, %c0_24] : memref<1x128xf32, #tpu.memory_space<vmem>>, vector<1x128xf32>
    %33 = arith.mulf %31, %32 : vector<1x128xf32>
    %c0_25 = arith.constant 0 : index
    %c0_26 = arith.constant 0 : index
    %c0_27 = arith.constant 0 : index
    %34 = vector.load %arg6[%c0_25, %c0_26, %c0_27] : memref<1x8x128xf32, #tpu.memory_space<vmem>>, vector<1x8x128xf32>
    %35 = vector.shape_cast %34 : vector<1x8x128xf32> to vector<8x128xf32>
    %36 = vector.shape_cast %17 : vector<8x128xf32> to vector<1x8x128xf32>
    tpu.vector_store %arg6[%c0_25, %c0_26, %c0_27], %36 {strides = array<i32>} : memref<1x8x128xf32, #tpu.memory_space<vmem>>, vector<1x8x128xf32>,
    %c0_28 = arith.constant 0 : index
    %c0_29 = arith.constant 0 : index
    %c0_30 = arith.constant 0 : index
    %37 = vector.load %arg7[%c0_28, %c0_29, %c0_30] : memref<1x1x128xf32, #tpu.memory_space<vmem>>, vector<1x1x128xf32>
    %38 = vector.shape_cast %37 : vector<1x1x128xf32> to vector<1x128xf32>
    %39 = vector.shape_cast %33 : vector<1x128xf32> to vector<1x1x128xf32>
    tpu.vector_store %arg7[%c0_28, %c0_29, %c0_30], %39 {strides = array<i32>} : memref<1x1x128xf32, #tpu.memory_space<vmem>>, vector<1x1x128xf32>,
    %cst_31 = arith.constant dense<0.000000e+00> : vector<128xf32>
    %40 = vector.multi_reduction <add>, %17, %cst_31 [0] : vector<8x128xf32> to vector<128xf32>
    %41 = vector.shape_cast %40 : vector<128xf32> to vector<1x128xf32>
    %cst_32 = arith.constant 1.250000e-01 : f32
    %42 = vector.broadcast %cst_32 : f32 to vector<1x128xf32>
    %43 = arith.mulf %41, %42 : vector<1x128xf32>
    %44 = arith.negf %43 : vector<1x128xf32>
    %45 = math.exp %44 : vector<1x128xf32>
    %cst_33 = arith.constant 1.000000e+00 : f32
    %46 = vector.broadcast %cst_33 : f32 to vector<1x128xf32>
    %47 = arith.addf %46, %45 : vector<1x128xf32>
    %48 = arith.divf %46, %47 : vector<1x128xf32>
    %c0_34 = arith.constant 0 : index
    %c0_35 = arith.constant 0 : index
    %c0_36 = arith.constant 0 : index
    %49 = vector.load %arg8[%c0_34, %c0_35, %c0_36] : memref<1x1x128xf32, #tpu.memory_space<vmem>>, vector<1x1x128xf32>
    %50 = vector.shape_cast %49 : vector<1x1x128xf32> to vector<1x128xf32>
    %51 = vector.shape_cast %48 : vector<1x128xf32> to vector<1x1x128xf32>
    tpu.vector_store %arg8[%c0_34, %c0_35, %c0_36], %51 {strides = array<i32>} : memref<1x1x128xf32, #tpu.memory_space<vmem>>, vector<1x1x128xf32>,
    return
  }
  func.func @transform_0(%arg0: i32) -> (i32, i32, i32, i32) {
    %c0_i32 = arith.constant 0 : i32
    %c0_i32_0 = arith.constant 0 : i32
    %c0_i32_1 = arith.constant 0 : i32
    %c0_i32_2 = arith.constant 0 : i32
    return %arg0, %c0_i32, %c0_i32_0, %c0_i32_1 : i32, i32, i32, i32
  }
  func.func @transform_1(%arg0: i32) -> (i32, i32, i32) {
    %c0_i32 = arith.constant 0 : i32
    %c0_i32_0 = arith.constant 0 : i32
    %c0_i32_1 = arith.constant 0 : i32
    return %arg0, %c0_i32, %c0_i32_0 : i32, i32, i32
  }
  func.func @transform_2(%arg0: i32) -> (i32, i32) {
    %c0_i32 = arith.constant 0 : i32
    %c0_i32_0 = arith.constant 0 : i32
    %c0_i32_1 = arith.constant 0 : i32
    return %c0_i32, %c0_i32_0 : i32, i32
  }
  func.func @transform_3(%arg0: i32) -> (i32, i32) {
    %c0_i32 = arith.constant 0 : i32
    %c0_i32_0 = arith.constant 0 : i32
    %c0_i32_1 = arith.constant 0 : i32
    return %c0_i32, %c0_i32_0 : i32, i32
  }
  func.func @transform_4(%arg0: i32) -> (i32, i32) {
    %c0_i32 = arith.constant 0 : i32
    %c0_i32_0 = arith.constant 0 : i32
    %c0_i32_1 = arith.constant 0 : i32
    return %c0_i32, %c0_i32_0 : i32, i32
  }
  func.func @transform_5(%arg0: i32) -> (i32, i32, i32) {
    %c0_i32 = arith.constant 0 : i32
    %c0_i32_0 = arith.constant 0 : i32
    %c0_i32_1 = arith.constant 0 : i32
    return %arg0, %c0_i32, %c0_i32_0 : i32, i32, i32
  }
  func.func @transform_6(%arg0: i32) -> (i32, i32, i32) {
    %c0_i32 = arith.constant 0 : i32
    %c0_i32_0 = arith.constant 0 : i32
    %c0_i32_1 = arith.constant 0 : i32
    return %arg0, %c0_i32, %c0_i32_0 : i32, i32, i32
  }
  func.func @transform_7(%arg0: i32) -> (i32, i32, i32) {
    %c0_i32 = arith.constant 0 : i32
    %c0_i32_0 = arith.constant 0 : i32
    %c0_i32_1 = arith.constant 0 : i32
    return %arg0, %c0_i32, %c0_i32_0 : i32, i32, i32
  }
}

</mosaic_0001>

<bundles_post_ra>
// kernel: learner_steps.1
= control target key start
LH: loop header
LB: loop body
LE: loop exit
PB: predicated region body
PF: predicated region fallthrough
CT: control target
= control target key end

     0   :  { %s1298_s0 = inlined_call_operand.hbm [shape: f32[4,4,8,128], index: 0, kind: input, shape index: {}]   ;;  %s1299_s1 = inlined_call_operand.hbm [shape: bf16[4,8,32], index: 1, kind: input, shape index: {}]   ;;  %s1300_s2 = inlined_call_operand.hbm [shape: bf16[32,128], index: 2, kind: input, shape index: {}]   ;;  %s1301_s3 = inlined_call_operand.vmem [shape: f32[1,128], index: 3, kind: input, shape index: {}]   ;;  %s1302_s4 = inlined_call_operand.vmem [shape: f32[1,128], index: 4, kind: input, shape index: {}]   ;;  %s1303_s5 = inlined_call_operand.hbm [shape: f32[4,8,128], index: 5, kind: output, shape index: {0}]   ;;  %s1304_s6 = inlined_call_operand.vmem [shape: f32[4,1,128], index: 6, kind: output, shape index: {1}]   ;;  %s1305_s7 = inlined_call_operand.hbm [shape: f32[4,1,128], index: 7, kind: output, shape index: {2}]  }
   0x1   :  { %1315 = sst [smem:[#allocation21_spill]] %s1298_s0 }
   0x2   :  { %1316 = sst [smem:[#allocation22_spill]] %s1300_s2 }
   0x3   :  { %13 = vsyncpa [#allocation3], 0 }
   0x4   :  { %15 = vsyncpa [#allocation3 + $0x1], 0 }
   0x5   :  { %16 = vsyncpa [#allocation6], 0 }
   0x6   :  { %18 = vsyncpa [#allocation6 + $0x1], 0 }
   0x7   :  { %19 = vsyncpa [#allocation4], 0 }
   0x8   :  { %21 = vsyncpa [#allocation4 + $0x1], 0 }
   0x9   :  { %22 = vsyncpa [#allocation10], 0 }
   0xa   :  { %24 = vsyncpa [#allocation10 + $0x1], 0  ;;  %s1032_s24 = smov 0   ;;  %s1034_s25 = smov 0  }
   0xb   :  { %s1036_s26 = smov 0   ;;  %s1038_s27 = smov 0  }
   0xc LB: > { %1317 = sst [smem:[#allocation16_spill]] %s967_s24  ;;  %s1053_s28 = sadd.s32 4294967295, %s979_s27   ;;  %s979_s27 = sphi %s1038_s27, %s1340_s27   ;;  %s975_s26 = sphi %s1036_s26, %s1342_s26   ;;  %s971_s25 = sphi %s1034_s25, %s1344_s25   ;;  %s967_s24 = sphi %s1032_s24, %s1343_s24  }
   0xd   : > { %1318 = sst [smem:[#allocation17_spill]] %s975_s26  ;;  %s673_s29 = sadd.s32 4294967294, %s979_s27  }
   0xe   : > { %p50_p0 = scmp.ne.s32.totalorder %s971_s25, %s967_s24  ;;  %p1306_p1 = scmp.eq.s32.totalorder %s1053_s28, 0 }
   0xf   : > { %p169_p3 = scmp.eq.s32.totalorder %s673_s29, 3  ;;  %p674_p5 = scmp.ge.s32.totalorder %s979_s27, 1 }
  0x10   : > { %p1062_p4 = por %p1306_p1, %p50_p0  ;;  %p228_p7 = scmp.lt.s32.totalorder %s979_s27, 5 }
  0x11   : > { %p1067_p6 = por %p169_p3, %p50_p0  ;;  %s981_s10 = smov [#allocation7]  }
  0x12   : > { %s1319_s30 = scalar_select %p1062_p4, 1, 0 }
  0x13   : > { %s1320_s8 = scalar_select %p1067_p6, 1, 0 }
  0x14   : > { %p1072_p8 = pnand %p674_p5, %p228_p7  ;;  %s240_s11 = sshll.u32 %s981_s10, 4  ;;  %s241_s11 = int_to_ptr.vmem [resolvable:$true] %s240_s11 }
  0x15   : > { %1321 = sst [smem:[#allocation18_spill]] %s1320_s8  ;;  %s1085_s13 = sadd.s32 1, %s979_s27  }
  0x16   : > { %s1322_s9 = scalar_select %p1072_p8, 1, 0 }
  0x17   : > { %p724_p9 = pneg %p1072_p8  ;;  %1324 = sst [smem:[#allocation19_spill]] %s1085_s13 }
  0x18   : > { %s37_s14 = sadd.s32 1, %s975_s26  ;;  %s34_s15 = ssub.s32 %s979_s27, %s1085_s13 }
  0x19   : > { %p1080_p10 = pnand %p724_p9, %p1306_p1  ;;  %s806_s16 = scalar_lea.vmem %s241_s11, 256 }
  0x1a   : > { %p807_p12 = scmp.ne.s32.totalorder %s241_s11, %s806_s16  ;;  %p814_p3 = scmp.lt.s32.totalorder %s241_s11, %s241_s11 }
  0x1b   : > { %p797_p11 = pneg %p1080_p10  ;;  %p815_p5 = scmp.lt.s32.totalorder %s806_s16, %s806_s16 }
  0x1d   : > { %p809_p13 = pnand %p807_p12, %p797_p11  ;;  %p816_p7 = por %p815_p5, %p814_p3 }
  0x1f   : > { %p810_p0 = pneg %p809_p13 }
  0x21   : > { %p817_p2 = pnand %p816_p7, %p810_p0 }
  0x23   : > { %820 = shalt.err (!%p817_p2)
}
  0x24   : > { %s982_s17 = smov 64   ;;  %s983_s18 = smov 4  }
  0x25   : > { %s1325_s2 = sld [smem:[#allocation22_spill]]  ;;  %p35_p9 = scmp.eq.s32.totalorder %s34_s15, 0 }
  0x26   : > { %p44_p11 = scmp.ne.s32.totalorder %s975_s26, %s971_s25  ;;  %p45_p12 = scmp.eq.s32.totalorder %s979_s27, 0 }
  0x27   : > { %p743_p2 = scmp.lt.s32.totalorder %s979_s27, 4  ;;  %p1327_p0 = scmp.eq.s32.totalorder %s1053_s28, 3 }
  0x28   : > { %s1102_s21 = scalar_select %p35_p9, %s975_s26, %s37_s14  }
  0x29   : > { %p46_p13 = por %p45_p12, %p44_p11  ;;  %p1106_p3 = por %p1327_p0, %p44_p11 }
  0x2a   : > { %1326 = sst [smem:[#allocation20_spill]] %s1102_s21  ;;  %s1111_s23 = sand.u32 1, %s975_s26  }
  0x2b   : > { %727 = dma.hbm_to_vmem [thread:$0]  (!%p1080_p10), %s1325_s2, 256, %s241_s11, [#allocation6], %s982_s17, %s982_s17, %s983_s18  }
  0x2c   : > { %s1328_s22 = scalar_select %p1106_p3, 1, 0 }
  0x2d   : > { %s700_s29 = sshll.u32 %s979_s27, 9  ;;  %s677_s10 = sshll.u32 %s1111_s23, 5 }
  0x2e   : > { %s1329_s0 = sld [smem:[#allocation21_spill]]  ;;  %s264_s14 = scalar_lea.vmem [#allocation2], %s677_s10 }
  0x2f   : > { %s271_s16 = sshll.u32 %s264_s14, 4  ;;  %p1120_p10 = pnand %p743_p2, %p46_p13  ;;  %s1124_s16 = int_to_ptr.vmem [resolvable:$true] %s271_s16 }
  0x31   : > { %p823_p7 = pneg %p1120_p10 }
  0x34   : > { %s1118_s15 = scalar_lea.hbm %s1329_s0, %s700_s29  ;;  %s826_s10 = scalar_lea.hbm %s1329_s0, 2048 }
  0x35   : > { %s821_s19 = scalar_lea.hbm %s1118_s15, 512  ;;  %p827_p12 = scmp.lt.s32.totalorder %s1118_s15, %s1329_s0 }
  0x36   : > { %p822_p5 = scmp.ne.s32.totalorder %s1118_s15, %s821_s19  ;;  %p828_p2 = scmp.lt.s32.totalorder %s826_s10, %s821_s19 }
  0x38   : > { %p824_p9 = pnand %p823_p7, %p822_p5  ;;  %p829_p13 = por %p828_p2, %p827_p12 }
  0x3a   : > { %p825_p11 = pneg %p824_p9 }
  0x3c   : > { %p830_p0 = pnand %p829_p13, %p825_p11 }
  0x3e   : > { %833 = shalt.err (!%p830_p0)
}
  0x3f   : > { %s834_s14 = scalar_lea.vmem %s1124_s16, 512  ;;  %s984_s20 = smov [#allocation2]  }
  0x40   : > { %p835_p1 = scmp.ne.s32.totalorder %s1124_s16, %s834_s14  ;;  %s839_s29 = sshll.u32 %s984_s20, 4  ;;  %s840_s29 = int_to_ptr.vmem [resolvable:$false] %s839_s29 }
  0x41   : > { %s841_s18 = scalar_lea.vmem %s840_s29, 1024  ;;  %p842_p6 = scmp.lt.s32.totalorder %s1124_s16, %s840_s29 }
  0x42   : > { %p837_p5 = pnand %p835_p1, %p823_p7  ;;  %p843_p3 = scmp.lt.s32.totalorder %s841_s18, %s834_s14 }
  0x44   : > { %p838_p9 = pneg %p837_p5  ;;  %p844_p4 = por %p843_p3, %p842_p6 }
  0x46   : > { %p845_p12 = pnand %p844_p4, %p838_p9 }
  0x48   : > { %848 = shalt.err (!%p845_p12)
}
  0x49   : > { %s985_s19 = smov 128   ;;  %s986_s10 = smov 8  }
  0x4a   : > { %s1331_s12 = scalar_lea.sflag [#allocation3], %s1111_s23  ;;  %s281_s11 = sand.u32 1, %s979_s27  }
  0x4b   : > { %731 = dma.hbm_to_vmem [thread:$0]  (!%p1120_p10), %s1118_s15, 512, %s1124_s16, %s1331_s12, %s985_s19, %s985_s19, %s986_s10  }
  0x4c   : > { %s680_s20 = sshll.u32 %s1111_s23, 2  ;;  %s681_s29 = sshll.u32 %s979_s27, 6 }
  0x4d   : > { %s285_s18 = scalar_lea.vmem [#allocation5], %s680_s20  ;;  %s290_s21 = scalar_lea.hbm %s1299_s1, %s681_s29 }
  0x4e   : > { %s292_s14 = sshll.u32 %s285_s18, 4  ;;  %s282_s26 = scalar_lea.sflag [#allocation6], %s281_s11  ;;  %s293_s14 = int_to_ptr.vmem [resolvable:$true] %s292_s14 }
  0x4f   : > { %s849_s13 = scalar_lea.hbm %s290_s21, 64  ;;  %s854_s15 = scalar_lea.hbm %s1299_s1, 256 }
  0x50   : > { %p850_p1 = scmp.ne.s32.totalorder %s290_s21, %s849_s13  ;;  %p855_p3 = scmp.lt.s32.totalorder %s290_s21, %s1299_s1 }
  0x51   : > { %p856_p11 = scmp.lt.s32.totalorder %s854_s15, %s849_s13 }
  0x52   : > { %p852_p4 = pnand %p850_p1, %p823_p7 }
  0x53   : > { %p857_p2 = por %p856_p11, %p855_p3 }
  0x54   : > { %p853_p6 = pneg %p852_p4 }
  0x56   : > { %p858_p13 = pnand %p857_p2, %p853_p6 }
  0x58   : > { %861 = shalt.err (!%p858_p13)
}
  0x59   : > { %s862_s0 = scalar_lea.vmem %s293_s14, 64  ;;  %s987_s2 = smov [#allocation5]  }
  0x5a   : > { %p863_p0 = scmp.ne.s32.totalorder %s293_s14, %s862_s0  ;;  %s867_s19 = sshll.u32 %s987_s2, 4  ;;  %s868_s19 = int_to_ptr.vmem [resolvable:$false] %s867_s19 }
  0x5b   : > { %s869_s24 = scalar_lea.vmem %s868_s19, 128  ;;  %p870_p12 = scmp.lt.s32.totalorder %s293_s14, %s868_s19 }
  0x5c   : > { %p865_p5 = pnand %p863_p0, %p823_p7  ;;  %p871_p1 = scmp.lt.s32.totalorder %s869_s24, %s862_s0 }
  0x5e   : > { %p866_p9 = pneg %p865_p5  ;;  %p872_p4 = por %p871_p1, %p870_p12 }
  0x60   : > { %p873_p8 = pnand %p872_p4, %p866_p9 }
  0x62   : > { %876 = shalt.err (!%p873_p8)
}
  0x63   : > { %734 = dma.hbm_to_vmem [thread:$0]  (!%p1120_p10), %s290_s21, 64, %s293_s14, %s282_s26  }
  0x64   : > { %p1332_p6 = scmp.ne.s32.totalorder %s1322_s9, 0 }
  0x65   : > { %s1176_s8 = sand.u32 (!%p1332_p6), 1, %s971_s25   ;;  %p1333_p7 = scmp.ne.s32.totalorder (!%p1332_p6), %s1319_s30, 0 }
  0x66   : > { %301 = sbr.rel (%p1332_p6) target bundleno = 397 (0x18d), region = 40  ;;  %s683_s13 = sshll.u32 (!%p1332_p6), %s1176_s8, 5 }
  0x67   : > { %s304_s10 = scalar_lea.sflag (!%p1332_p6), [#allocation3], %s1176_s8  ;;  %s1180_s12 = scalar_lea.vmem (!%p1332_p6), [#allocation2], %s683_s13 }
  0x6b   : > { %946 = dma.done.wait (%p1333_p7), %s304_s10, 512  }
  0x6c   : > { %948 = vsyncadd (%p1333_p7), %s304_s10, 4294966784  ;;  %s312_s26 = sand.u32 1, %s1053_s28   ;;  %s684_s9 = sshll.u32 %s1176_s8, 2 }
  0x6d   : > { %s313_s21 = scalar_lea.sflag [#allocation6], %s312_s26  ;;  %s316_s17 = scalar_lea.vmem [#allocation5], %s684_s9 }
  0x6e   : > { %950 = dma.done.wait (%p1333_p7), %s313_s21, 64  }
  0x6f   : > { %952 = vsyncadd (%p1333_p7), %s313_s21, 4294967232  ;;  %p1334_p8 = scmp.eq.s32.totalorder %s1053_s28, 0 }
  0x71   : > { %954 = dma.done.wait (%p1334_p8), [#allocation6], 256   ;;  %p1335_p10 = pmov %p1334_p8 }
  0x72   : > { %v988_v0 = vmov 0.0   ;;  %vm989_vm0 = vmmov 0   ;;  %v785_v1 = vld [vmem:[#allocation7 + $0x8] sm:$0xff]   ;;  %v786_v2 = vld [vmem:[#allocation7] sm:$0xff]   ;;  %v377_v3 = vld [vmem:[%s316_s17] sm:$0xf] }
  0x73   : > { %956 = vsyncadd (%p1335_p10), [#allocation6], 4294967040  ;;  %704 = vmatprep.subr.bf16.mxu0 %v988_v0  ;;  %708 = vmatprep.mubr.msk.bf16.mxu0 %vm989_vm0, %v988_v0  ;;  %vm401_vm1 = vcmask 261120   ;;  %s686_s30 = sshll.u32 %s1176_s8, 3  ;;  %v690_v4 = vld [vmem:[%s1301_s3] ss:$0 sm:$0xff] }
  0x74   : > { %705 = vmatpush3.bf16.msra.mxu0 %v785_v1  ;;  %s696_s29 = sshll.u32 %s1053_s28, 7  ;;  %s351_s18 = scalar_lea.vmem [#allocation8], %s686_s30 }
  0x75   : > { %706 = vmatprep.subr.bf16.mxu0 %v988_v0  ;;  %s508_s14 = sshll.u32 %s351_s18, 4  ;;  %s1206_s16 = scalar_lea.hbm %s1303_s5, %s696_s29  ;;  %s1208_s14 = int_to_ptr.vmem [resolvable:$true] %s508_s14 }
  0x76   : > { %s488_s0 = scalar_lea.sflag [#allocation4], %s1176_s8  ;;  %s877_s2 = scalar_lea.vmem %s1208_s14, 128 }
  0x77   : > { %p878_p3 = scmp.ne.s32.totalorder %s1208_s14, %s877_s2  ;;  %p1336_p11 = scmp.ne.s32.totalorder %s1328_s22, 0 }
  0x78   : > { %707 = vmatpush3.bf16.msra.mxu0 %v786_v2  ;;  %s990_s19 = smov [#allocation8]  }
  0x79   : > { %p879_p2 = pnand %p878_p3, %p1336_p11  ;;  %s881_s24 = sshll.u32 %s990_s19, 4  ;;  %s882_s24 = int_to_ptr.vmem [resolvable:$false] %s881_s24 }
  0x7a   : > { %s883_s13 = scalar_lea.vmem %s882_s24, 256  ;;  %p884_p0 = scmp.lt.s32.totalorder %s1208_s14, %s882_s24 }
  0x7b   : > { %709 = vmatmul.mubr.msk.bf16.vlgmr.msra.gmra.mxu0 %vm401_vm1, %v377_v3  ;;  %p880_p13 = pneg %p879_p2  ;;  %p885_p5 = scmp.lt.s32.totalorder %s883_s13, %s877_s2 }
  0x7d   : > { %p886_p9 = por %p885_p5, %p884_p0 }
  0x7f   : > { %p887_p12 = pnand %p886_p9, %p880_p13 }
 0x13b   : > { %v439_v5 = vpop.f32.mrf.mxu0 }
 0x13c   : > { %v1201_v6 = vadd.f32 %v690_v4, %v439_v5 }
 0x13d   : > { %v710_v7 = vpop.f32.mrf.mxu0 }
 0x13e   : > { %v448_v8 = vand.u32 2147483647, %v1201_v6  ;;  %v473_v9 = vrot.slane %v1201_v6, 4  ;;  %471 = vst [vmem:[%s351_s18] sm:$0xff] %v1201_v6 }
 0x13f   : > { %v442_v10 = vpop.f32.mrf.mxu0 }
 0x140   : > { %890 = shalt.err (!%p887_p12)
}
 0x141   : > { %s891_s10 = scalar_lea.hbm %s1206_s16, 128  ;;  %s895_s21 = scalar_lea.hbm %s1303_s5, 512 }
 0x142   : > { %p892_p1 = scmp.ne.s32.totalorder %s1206_s16, %s891_s10  ;;  %p896_p7 = scmp.lt.s32.totalorder %s1206_s16, %s1303_s5 }
 0x143   : > { %p897_p8 = scmp.lt.s32.totalorder %s895_s21, %s891_s10 }
 0x144   : > { %p893_p4 = pnand %p892_p1, %p1336_p11 }
 0x145   : > { %p898_p10 = por %p897_p8, %p896_p7 }
 0x146   : > { %p894_p6 = pneg %p893_p4 }
 0x148   : > { %p899_p3 = pnand %p898_p10, %p894_p6 }
 0x14a   : > { %902 = shalt.err (!%p899_p3)
}
 0x14b   : > { %720 = dma.vmem_to_hbm [thread:$0]  (%p1336_p11), %s1208_s14, 128, %s1206_s16, %s488_s0   ;;  %v449_v11 = vsub.f32 0.0, %v448_v8  ;;  %v474_v12 = vadd.f32 %v473_v9, %v1201_v6  ;;  %v711_v13 = vpop.f32.mrf.mxu0  ;;  %v367_v21 = vld [vmem:[%s1180_s12] sm:$0xff]  ;;  %v687_v22 = vld [vmem:[%s1180_s12 + $0x8] sm:$0xff]  ;;  %v688_v26 = vld [vmem:[%s1180_s12 + $0x10] sm:$0xff]  ;;  %v445_v34 = vmax.f32 %v1201_v6, 0.0 }
 0x14c   : > { %v370_v25 = vmax.f32 %v367_v21, %v687_v22  ;;  %v689_v28 = vld [vmem:[%s1180_s12 + $0x18] sm:$0xff]  ;;  %s697_s12 = sshll.u32 %s1053_s28, 4  ;;  %s362_s11 = scalar_lea.vmem [#allocation9], %s1176_s8 }
 0x14d   : > { %v450_v14 = vmul.f32 1.442695, %v449_v11  ;;  %v475_v15 = vrot.slane %v474_v12, 2  ;;  %s524_s20 = sshll.u32 %s362_s11, 4  ;;  %s1246_s14 = scalar_lea.hbm %s1305_s7, %s697_s12  ;;  %s1248_s20 = int_to_ptr.vmem [resolvable:$true] %s524_s20 }
 0x14e   : > { %v373_v27 = vmax.f32 %v370_v25, %v688_v26  ;;  %p363_p2 = scmp.lt.s32.totalorder %s1053_s28, 3  ;;  %s496_s15 = scalar_lea.sflag [#allocation10], %s1176_s8 }
 0x14f   : > { %787 = vpow2.f32 %v450_v14  ;;  %v476_v16 = vadd.f32 %v475_v15, %v474_v12  ;;  %s903_s23 = scalar_lea.vmem %s1248_s20, 16  ;;  %s991_s16 = smov [#allocation9]  }
 0x150   : > { %v376_v31 = vmax.f32 %v373_v27, %v689_v28  ;;  %p904_p13 = scmp.ne.s32.totalorder %s1248_s20, %s903_s23  ;;  %s907_s0 = sshll.u32 %s991_s16, 4  ;;  %s908_s0 = int_to_ptr.vmem [resolvable:$false] %s907_s0 }
 0x151   : > { %v477_v17 = vrot.slane %v476_v16, 1  ;;  %s909_s2 = scalar_lea.vmem %s908_s0, 32  ;;  %p910_p9 = scmp.lt.s32.totalorder %s1248_s20, %s908_s0 }
 0x152   : > { %v446_v35 = vmul.f32 %v1201_v6, %v376_v31  ;;  %p905_p0 = pnand %p904_p13, %p1336_p11  ;;  %p911_p12 = scmp.lt.s32.totalorder %s909_s2, %s903_s23 }
 0x153   : > { %v478_v18 = vadd.f32 %v477_v17, %v476_v16 }
 0x154   : > { %v447_v40 = vsub.f32 %v445_v34, %v446_v35  ;;  %p906_p5 = pneg %p905_p0  ;;  %p912_p1 = por %p911_p12, %p910_p9 }
 0x155   : > { %v694_v19 = vmul.f32 -0.125, %v478_v18 }
 0x156   : > { %p913_p4 = pnand %p912_p1, %p906_p5 }
 0x157   : > { %v481_v20 = vmul.f32 1.442695, %v694_v19 }
 0x159   : > { %789 = vpow2.f32 %v481_v20 }
 0x15c   : > { %v788_v23 = vpop.eup %787 }
 0x15d   : > { %v452_v24 = vadd.f32 1.0, %v788_v23  ;;  %v455_v29 = vmul.f32 -0.5, %v788_v23  ;;  %v458_v36 = vand.u32 2147483647, %v788_v23 }
 0x15f   : > { %791 = vlog2.f32 %v452_v24  ;;  %v456_v33 = vadd.f32 1.0, %v455_v29  ;;  %vm459_vm2 = vcmp.lt.f32.partialorder %v458_v36, 0.0004427343 }
 0x161   : > { %v457_v39 = vmul.f32 %v788_v23, %v456_v33 }
 0x166   : > { %v790_v30 = vpop.eup %789 }
 0x167   : > { %v483_v32 = vadd.f32 1.0, %v790_v30 }
 0x169   : > { %793 = vrcp.f32 %v483_v32 }
 0x16c   : > { %v792_v37 = vpop.eup %791 }
 0x16d   : > { %v454_v38 = vmul.f32 0.6931472, %v792_v37 }
 0x16f   : > { %v460_v41 = vsel %vm459_vm2, %v457_v39, %v454_v38 }
 0x170   : > { %v461_v42 = vadd.f32 %v460_v41, %v447_v40 }
 0x172   : > { %v462_v43 = vrot.slane %v461_v42, 4 }
 0x174   : > { %v463_v44 = vadd.f32 %v462_v43, %v461_v42 }
 0x176   : > { %v794_v45 = vpop.eup %793  ;;  %v464_v46 = vrot.slane %v463_v44, 2 }
 0x177   : > { %486 = vst [vmem:[%s362_s11] sm:$0x1] %v794_v45 }
 0x178   : > { %v465_v47 = vadd.f32 %v464_v46, %v463_v44 }
 0x179   : > { %916 = shalt.err (!%p913_p4)
}
 0x17a   : > { %s917_s19 = scalar_lea.hbm %s1246_s14, 16  ;;  %s921_s13 = scalar_lea.hbm %s1305_s7, 64 }
 0x17b   : > { %p918_p6 = scmp.ne.s32.totalorder %s1246_s14, %s917_s19  ;;  %p922_p10 = scmp.lt.s32.totalorder %s1246_s14, %s1305_s7 }
 0x17c   : > { %p923_p3 = scmp.lt.s32.totalorder %s921_s13, %s917_s19 }
 0x17d   : > { %p919_p7 = pnand %p918_p6, %p1336_p11 }
 0x17e   : > { %p924_p13 = por %p923_p3, %p922_p10 }
 0x17f   : > { %p920_p8 = pneg %p919_p7 }
 0x181   : > { %p925_p0 = pnand %p924_p13, %p920_p8 }
 0x183   : > { %928 = shalt.err (!%p925_p0)
}
 0x184   : > { %721 = dma.vmem_to_hbm [thread:$0]  (%p1336_p11), %s1248_s20, 16, %s1246_s14, %s496_s15   ;;  %v466_v48 = vrot.slane %v465_v47, 1  ;;  %v469_v50 = vld [vmem:[%s1302_s4] sm:$0x1] }
 0x185   : > { %s1346_s28 = smov (!%p363_p2, %s1053_s28), 3 }
 0x186   : > { %v467_v49 = vadd.f32 %v466_v48, %v465_v47  ;;  %s365_s12 = scalar_lea.vmem %s1304_s6, %s1346_s28 }
 0x188   : > { %v468_v51 = vmul.f32 0.125, %v467_v49 }
 0x18a   : > { %v470_v52 = vmul.f32 %v469_v50, %v468_v51 }
 0x18c   : > { %472 = vst [vmem:[%s365_s12] sm:$0x1] %v470_v52 }
 0x18d PF: > { %s1337_s22 = sld [smem:[#allocation16_spill]]  ;;  %p745_p11 = scmp.ge.s32.totalorder %s979_s27, 2 }
 0x18e   : > { %s1338_s11 = sld [smem:[#allocation18_spill]] }
 0x193   : > { %s536_s20 = sand.u32 1, %s1337_s22  }
 0x194   : > { %p1339_p5 = scmp.ne.s32.totalorder %s1338_s11, 0  ;;  %s537_s29 = scalar_lea.sflag [#allocation4], %s536_s20 }
 0x196   : > { %p736_p2 = pnand %p745_p11, %p1339_p5 }
 0x198   : > { %p737_p9 = pneg %p736_p2 }
 0x19a   : > { %958 = dma.done.wait (%p737_p9), %s537_s29, 128  }
 0x19b   : > { %960 = vsyncadd (%p737_p9), %s537_s29, 4294967168  ;;  %s552_s18 = scalar_lea.sflag [#allocation10], %s536_s20 }
 0x19c   : > { %962 = dma.done.wait (%p737_p9), %s552_s18, 16  }
 0x19d   : > { %964 = vsyncadd (%p737_p9), %s552_s18, 4294967280  ;;  %s1340_s27 = sld [smem:[#allocation19_spill]]  ;;  %s1343_s24 = smov %s971_s25 }
 0x19e   : > { %s1341_s28 = sld [smem:[#allocation17_spill]] }
 0x19f   : > { %s1342_s26 = sld [smem:[#allocation20_spill]] }
 0x1a3   : > { %p27_p12 = scmp.ge.s32.totalorder %s1340_s27, 6  }
 0x1a4   : > { %s1344_s25 = smov %s1341_s28 }
 0x1a5   :  { %29 = sbr.rel (!%p27_p12) target bundleno = 12 (0xc), region = 134 }
 0x1aa   :  { %556 = vsyncpa [#allocation3], 1 }
 0x1ab   :  { %558 = vsyncpa [#allocation3 + $0x1], 1 }
 0x1ac   :  { %559 = vsyncpa [#allocation6], 1 }
 0x1ad   :  { %561 = vsyncpa [#allocation6 + $0x1], 1 }
 0x1ae   :  { %562 = vsyncpa [#allocation4], 1 }
 0x1af   :  { %564 = vsyncpa [#allocation4 + $0x1], 1 }
 0x1b0   :  { %565 = vsyncpa [#allocation10], 1 }
 0x1b1   :  { %567 = vsyncpa [#allocation10 + $0x1], 1 }

</bundles_post_ra>
